<compile_context>
chip_gen: v7x
topology: tpu7x:2x2x1
jax: 0.10.0
libtpu: 0.0.40
codegen_flags: <defaults>
</compile_context>

<pallas_src>
import functools

import jax
import jax.numpy as jnp
from jax import lax
from jax.experimental import pallas as pl
from jax.experimental.pallas import tpu as pltpu

EPS = 1e-5


def _resnet_block_kernel(x_ref, w1_ref, w2_ref, col_ref, row_ref, o_ref, *,
                         height, width):
    """One batch sample per grid step.

    x_ref  : (1, C, S) f32, S = H*W (NCHW flattened row-major, w fastest)
    w*_ref : (3, 3, C_out, C_in) bf16  (tap [ky, kx] is a (C_out, C_in) matrix)
    col_ref, row_ref : (1, S) int32    (static w / h index of each position)
    o_ref  : (1, C, S) f32
    """
    H, W = height, width
    S = H * W

    x = x_ref[0]                                   # (C, S) f32
    col = col_ref[...]                             # (1, S)
    row = row_ref[...]                             # (1, S)
    first_col = col == 0
    last_col = col == (W - 1)
    first_row = row == 0
    last_row = row == (H - 1)

    def conv3x3(t, w_ref):
        """Reflection-padded 3x3 conv. t: (C_in, S) f32 -> (C_out, S) f32."""
        # pltpu.roll follows jnp.roll semantics: out[p] = in[(p - shift) mod S].
        r_next = pltpu.roll(t, S - 1, 1)           # out[p] = t[p + 1]
        r_prev = pltpu.roll(t, 1, 1)               # out[p] = t[p - 1]
        # read column w+1 (reflect w=W-1 -> W-2) / w-1 (reflect w=0 -> 1)
        t_xp = jnp.where(last_col, r_prev, r_next)
        t_xm = jnp.where(first_col, r_next, r_prev)
        # kx = 0,1,2  <->  dx = -1,0,+1 ; bf16 operands, f32 accumulation on the MXU.
        taps = (t_xm.astype(jnp.bfloat16),
                t.astype(jnp.bfloat16),
                t_xp.astype(jnp.bfloat16))

        def row_group(ky):                         # partial sum for one weight row
            u = jnp.dot(w_ref[ky, 0], taps[0], preferred_element_type=jnp.float32)
            u = u + jnp.dot(w_ref[ky, 1], taps[1], preferred_element_type=jnp.float32)
            u = u + jnp.dot(w_ref[ky, 2], taps[2], preferred_element_type=jnp.float32)
            return u                               # (C_out, S) f32

        u_top, u_mid, u_bot = row_group(0), row_group(1), row_group(2)

        # out[h] = u_top[h-1] (reflect h=0 -> 1) + u_mid[h] + u_bot[h+1] (reflect h=H-1 -> H-2)
        top = jnp.where(first_row,
                        pltpu.roll(u_top, S - W, 1),   # reads row h+1 (only used at h=0)
                        pltpu.roll(u_top, W, 1))       # reads row h-1
        bot = jnp.where(last_row,
                        pltpu.roll(u_bot, W, 1),       # reads row h-1 (only used at h=H-1)
                        pltpu.roll(u_bot, S - W, 1))   # reads row h+1
        return top + u_mid + bot

    def instance_norm(u, relu):
        # Single-pass stats: biased var = E[u^2] - mu^2 (matches InstanceNorm2d defaults).
        mu = jnp.mean(u, axis=1, keepdims=True)
        msq = jnp.mean(u * u, axis=1, keepdims=True)
        var = msq - mu * mu
        y = (u - mu) * lax.rsqrt(var + EPS)
        return jnp.maximum(y, 0.0) if relu else y      # ReLU fused into the normalize

    y = instance_norm(conv3x3(x, w1_ref), relu=True)
    y = instance_norm(conv3x3(y, w2_ref), relu=False)

    o_ref[0] = (x + y).astype(o_ref.dtype)             # residual add, lane-dense store


def resnet_block_nchw(x_nchw, w1, b1, w2, b2):
    """PyTorch-facing entry point: NCHW in / NCHW out.

    w1, w2: (C, C, 3, 3) OIHW conv weights.  b1, b2 are accepted for API parity but
    not applied: bias -> affine-free InstanceNorm is exactly cancelled by the mean
    subtraction, so it is mathematically dead work.
    """
    del b1, b2
    N, C, H, W = x_nchw.shape
    assert H >= 2 and W >= 2, "ReflectionPad2d(1) requires H, W >= 2"
    S = H * W

    # Free, contiguous reshape: no HBM transpose pass; H*W becomes the lane axis.
    x2 = x_nchw.reshape(N, C, S)
    # Taps as (3, 3, C_out, C_in), bf16 for the MXU (accumulation stays f32 in-kernel).
    w1k = jnp.transpose(w1, (2, 3, 0, 1)).astype(jnp.bfloat16)
    w2k = jnp.transpose(w2, (2, 3, 0, 1)).astype(jnp.bfloat16)
    # Static position indices (avoid in-kernel integer div/mod).
    pos = jnp.arange(S, dtype=jnp.int32)
    col_idx = (pos % W).reshape(1, S)
    row_idx = (pos // W).reshape(1, S)

    kernel = functools.partial(_resnet_block_kernel, height=H, width=W)
    y2 = pl.pallas_call(
        kernel,
        out_shape=jax.ShapeDtypeStruct((N, C, S), x_nchw.dtype),
        grid_spec=pltpu.PrefetchScalarGridSpec(
            num_scalar_prefetch=0,
            grid=(N,),
            in_specs=[
                pl.BlockSpec((1, C, S), lambda n: (n, 0, 0)),
                pl.BlockSpec((3, 3, C, C), lambda n: (0, 0, 0, 0)),
                pl.BlockSpec((3, 3, C, C), lambda n: (0, 0, 0, 0)),
                pl.BlockSpec((1, S), lambda n: (0, 0)),
                pl.BlockSpec((1, S), lambda n: (0, 0)),
            ],
            out_specs=pl.BlockSpec((1, C, S), lambda n: (n, 0, 0)),
        ),
        compiler_params=pltpu.CompilerParams(
            dimension_semantics=("parallel",),
            vmem_limit_bytes=64 * 1024 * 1024,
        ),
    )(x2, w1k, w2k, col_idx, row_idx)
    return y2.reshape(N, C, H, W)


def _reference_nchw(x, w1, b1, w2, b2):
    """Pure-JAX reference (bf16 conv inputs / f32 accumulation, matching the kernel)."""
    def conv(t, w, b):
        tp = jnp.pad(t, ((0, 0), (0, 0), (1, 1), (1, 1)), mode="reflect")
        y = lax.conv_general_dilated(
            tp.astype(jnp.bfloat16), w.astype(jnp.bfloat16),
            window_strides=(1, 1), padding="VALID",
            dimension_numbers=("NCHW", "OIHW", "NCHW"),
            preferred_element_type=jnp.float32)
        return y + b[None, :, None, None]

    def inorm(t):
        mu = jnp.mean(t, axis=(2, 3), keepdims=True)
        var = jnp.mean((t - mu) ** 2, axis=(2, 3), keepdims=True)
        return (t - mu) * lax.rsqrt(var + EPS)

    y = jnp.maximum(inorm(conv(x, w1, b1)), 0.0)
    y = inorm(conv(y, w2, b2))
    return x + y


if __name__ == "__main__":
    N, C, H, W = 2, 4, 16, 16
    key = jax.random.PRNGKey(0)
    kx, kw1, kb1, kw2, kb2 = jax.random.split(key, 5)

    x = jax.random.normal(kx, (N, C, H, W), dtype=jnp.float32)
    # Conv2d(dim, dim, 3, bias=True) x 2, PyTorch OIHW layout.
    w1 = jax.random.normal(kw1, (C, C, 3, 3), dtype=jnp.float32) * 0.1
    b1 = jax.random.normal(kb1, (C,), dtype=jnp.float32) * 0.05
    w2 = jax.random.normal(kw2, (C, C, 3, 3), dtype=jnp.float32) * 0.1
    b2 = jax.random.normal(kb2, (C,), dtype=jnp.float32) * 0.05

    out = resnet_block_nchw(x, w1, b1, w2, b2)
    out = jax.block_until_ready(out)

    ref = _reference_nchw(x, w1, b1, w2, b2)
    assert out.shape == (N, C, H, W)
    max_err = float(jnp.max(jnp.abs(out - ref)))
    assert jnp.allclose(out, ref, rtol=2e-2, atol=2e-2), f"mismatch vs reference: {max_err}"

    print("KERNEL_OK")
</pallas_src>

<mosaic_0001>
module attributes {stable_mosaic.version = 11 : i64} {
  func.func @_resnet_block_kernel(%arg0: i32, %arg1: memref<1x4x256xf32, #tpu.memory_space<vmem>>, %arg2: memref<3x3x4x4xbf16, #tpu.memory_space<vmem>>, %arg3: memref<3x3x4x4xbf16, #tpu.memory_space<vmem>>, %arg4: memref<1x256xi32, #tpu.memory_space<vmem>>, %arg5: memref<1x256xi32, #tpu.memory_space<vmem>>, %arg6: memref<1x4x256xf32, #tpu.memory_space<vmem>>) attributes {dimension_semantics = [#tpu.dimension_semantics<parallel>], iteration_bounds = array<i64: 2>, scalar_prefetch = 0 : i64, scratch_operands = 0 : i64, tpu.core_type = #tpu.core_type<tc>, window_params = [{transform_indices = @transform_0, window_bounds = array<i64: 1, 4, 256>}, {pipeline_mode = #tpu.pipeline_mode<synchronous>, transform_indices = @transform_1, window_bounds = array<i64: 3, 3, 4, 4>}, {pipeline_mode = #tpu.pipeline_mode<synchronous>, transform_indices = @transform_2, window_bounds = array<i64: 3, 3, 4, 4>}, {pipeline_mode = #tpu.pipeline_mode<synchronous>, transform_indices = @transform_3, window_bounds = array<i64: 1, 256>}, {pipeline_mode = #tpu.pipeline_mode<synchronous>, transform_indices = @transform_4, window_bounds = array<i64: 1, 256>}, {transform_indices = @transform_5, window_bounds = array<i64: 1, 4, 256>}]} {
    %c0 = arith.constant 0 : index
    %c0_0 = arith.constant 0 : index
    %c0_1 = arith.constant 0 : index
    %0 = vector.load %arg1[%c0, %c0_0, %c0_1] : memref<1x4x256xf32, #tpu.memory_space<vmem>>, vector<1x4x256xf32>
    %1 = vector.shape_cast %0 : vector<1x4x256xf32> to vector<4x256xf32>
    %c0_2 = arith.constant 0 : index
    %c0_3 = arith.constant 0 : index
    %2 = vector.load %arg4[%c0_2, %c0_3] : memref<1x256xi32, #tpu.memory_space<vmem>>, vector<1x256xi32>
    %c0_4 = arith.constant 0 : index
    %c0_5 = arith.constant 0 : index
    %3 = vector.load %arg5[%c0_4, %c0_5] : memref<1x256xi32, #tpu.memory_space<vmem>>, vector<1x256xi32>
    %c0_i32 = arith.constant 0 : i32
    %4 = vector.broadcast %c0_i32 : i32 to vector<1x256xi32>
    %5 = arith.cmpi eq, %2, %4 : vector<1x256xi32>
    %c15_i32 = arith.constant 15 : i32
    %6 = vector.broadcast %c15_i32 : i32 to vector<1x256xi32>
    %7 = arith.cmpi eq, %2, %6 : vector<1x256xi32>
    %c0_i32_6 = arith.constant 0 : i32
    %8 = vector.broadcast %c0_i32_6 : i32 to vector<1x256xi32>
    %9 = arith.cmpi eq, %3, %8 : vector<1x256xi32>
    %c15_i32_7 = arith.constant 15 : i32
    %10 = vector.broadcast %c15_i32_7 : i32 to vector<1x256xi32>
    %11 = arith.cmpi eq, %3, %10 : vector<1x256xi32>
    %c255_i32 = arith.constant 255 : i32
    %12 = tpu.dynamic_rotate %1 by %c255_i32 dim 1 : vector<4x256xf32>, i32 -> vector<4x256xf32>
    %c1_i32 = arith.constant 1 : i32
    %13 = tpu.dynamic_rotate %1 by %c1_i32 dim 1 : vector<4x256xf32>, i32 -> vector<4x256xf32>
    %14 = vector.shape_cast %7 : vector<1x256xi1> to vector<1x256xi1>
    %15 = vector.broadcast %14 : vector<1x256xi1> to vector<4x256xi1>
    %16 = arith.select %15, %13, %12 : vector<4x256xi1>, vector<4x256xf32>
    %17 = vector.shape_cast %5 : vector<1x256xi1> to vector<1x256xi1>
    %18 = vector.broadcast %17 : vector<1x256xi1> to vector<4x256xi1>
    %19 = arith.select %18, %12, %13 : vector<4x256xi1>, vector<4x256xf32>
    %20 = arith.truncf %19 : vector<4x256xf32> to vector<4x256xbf16>
    %21 = arith.truncf %1 : vector<4x256xf32> to vector<4x256xbf16>
    %22 = arith.truncf %16 : vector<4x256xf32> to vector<4x256xbf16>
    %c0_8 = arith.constant 0 : index
    %c0_9 = arith.constant 0 : index
    %c0_10 = arith.constant 0 : index
    %c0_11 = arith.constant 0 : index
    %23 = vector.load %arg2[%c0_8, %c0_9, %c0_10, %c0_11] : memref<3x3x4x4xbf16, #tpu.memory_space<vmem>>, vector<1x1x4x4xbf16>
    %24 = vector.shape_cast %23 : vector<1x1x4x4xbf16> to vector<4x4xbf16>
    %cst = arith.constant dense<0.000000e+00> : vector<4x256xf32>
    %25 = tpu.matmul %24, %20, %cst {dimension_numbers = #tpu.dot_dimension_numbers<[1], [0], [0], [1], [0, 0, 1, 1], [], []>} : vector<4x4xbf16>, vector<4x256xbf16>, vector<4x256xf32> -> vector<4x256xf32>
    %c0_12 = arith.constant 0 : index
    %c1 = arith.constant 1 : index
    %c0_13 = arith.constant 0 : index
    %c0_14 = arith.constant 0 : index
    %26 = vector.load %arg2[%c0_12, %c1, %c0_13, %c0_14] : memref<3x3x4x4xbf16, #tpu.memory_space<vmem>>, vector<1x1x4x4xbf16>
    %27 = vector.shape_cast %26 : vector<1x1x4x4xbf16> to vector<4x4xbf16>
    %cst_15 = arith.constant dense<0.000000e+00> : vector<4x256xf32>
    %28 = tpu.matmul %27, %21, %cst_15 {dimension_numbers = #tpu.dot_dimension_numbers<[1], [0], [0], [1], [0, 0, 1, 1], [], []>} : vector<4x4xbf16>, vector<4x256xbf16>, vector<4x256xf32> -> vector<4x256xf32>
    %29 = arith.addf %25, %28 : vector<4x256xf32>
    %c0_16 = arith.constant 0 : index
    %c2 = arith.constant 2 : index
    %c0_17 = arith.constant 0 : index
    %c0_18 = arith.constant 0 : index
    %30 = vector.load %arg2[%c0_16, %c2, %c0_17, %c0_18] : memref<3x3x4x4xbf16, #tpu.memory_space<vmem>>, vector<1x1x4x4xbf16>
    %31 = vector.shape_cast %30 : vector<1x1x4x4xbf16> to vector<4x4xbf16>
    %cst_19 = arith.constant dense<0.000000e+00> : vector<4x256xf32>
    %32 = tpu.matmul %31, %22, %cst_19 {dimension_numbers = #tpu.dot_dimension_numbers<[1], [0], [0], [1], [0, 0, 1, 1], [], []>} : vector<4x4xbf16>, vector<4x256xbf16>, vector<4x256xf32> -> vector<4x256xf32>
    %33 = arith.addf %29, %32 : vector<4x256xf32>
    %c1_20 = arith.constant 1 : index
    %c0_21 = arith.constant 0 : index
    %c0_22 = arith.constant 0 : index
    %c0_23 = arith.constant 0 : index
    %34 = vector.load %arg2[%c1_20, %c0_21, %c0_22, %c0_23] : memref<3x3x4x4xbf16, #tpu.memory_space<vmem>>, vector<1x1x4x4xbf16>
    %35 = vector.shape_cast %34 : vector<1x1x4x4xbf16> to vector<4x4xbf16>
    %cst_24 = arith.constant dense<0.000000e+00> : vector<4x256xf32>
    %36 = tpu.matmul %35, %20, %cst_24 {dimension_numbers = #tpu.dot_dimension_numbers<[1], [0], [0], [1], [0, 0, 1, 1], [], []>} : vector<4x4xbf16>, vector<4x256xbf16>, vector<4x256xf32> -> vector<4x256xf32>
    %c1_25 = arith.constant 1 : index
    %c1_26 = arith.constant 1 : index
    %c0_27 = arith.constant 0 : index
    %c0_28 = arith.constant 0 : index
    %37 = vector.load %arg2[%c1_25, %c1_26, %c0_27, %c0_28] : memref<3x3x4x4xbf16, #tpu.memory_space<vmem>>, vector<1x1x4x4xbf16>
    %38 = vector.shape_cast %37 : vector<1x1x4x4xbf16> to vector<4x4xbf16>
    %cst_29 = arith.constant dense<0.000000e+00> : vector<4x256xf32>
    %39 = tpu.matmul %38, %21, %cst_29 {dimension_numbers = #tpu.dot_dimension_numbers<[1], [0], [0], [1], [0, 0, 1, 1], [], []>} : vector<4x4xbf16>, vector<4x256xbf16>, vector<4x256xf32> -> vector<4x256xf32>
    %40 = arith.addf %36, %39 : vector<4x256xf32>
    %c1_30 = arith.constant 1 : index
    %c2_31 = arith.constant 2 : index
    %c0_32 = arith.constant 0 : index
    %c0_33 = arith.constant 0 : index
    %41 = vector.load %arg2[%c1_30, %c2_31, %c0_32, %c0_33] : memref<3x3x4x4xbf16, #tpu.memory_space<vmem>>, vector<1x1x4x4xbf16>
    %42 = vector.shape_cast %41 : vector<1x1x4x4xbf16> to vector<4x4xbf16>
    %cst_34 = arith.constant dense<0.000000e+00> : vector<4x256xf32>
    %43 = tpu.matmul %42, %22, %cst_34 {dimension_numbers = #tpu.dot_dimension_numbers<[1], [0], [0], [1], [0, 0, 1, 1], [], []>} : vector<4x4xbf16>, vector<4x256xbf16>, vector<4x256xf32> -> vector<4x256xf32>
    %44 = arith.addf %40, %43 : vector<4x256xf32>
    %c2_35 = arith.constant 2 : index
    %c0_36 = arith.constant 0 : index
    %c0_37 = arith.constant 0 : index
    %c0_38 = arith.constant 0 : index
    %45 = vector.load %arg2[%c2_35, %c0_36, %c0_37, %c0_38] : memref<3x3x4x4xbf16, #tpu.memory_space<vmem>>, vector<1x1x4x4xbf16>
    %46 = vector.shape_cast %45 : vector<1x1x4x4xbf16> to vector<4x4xbf16>
    %cst_39 = arith.constant dense<0.000000e+00> : vector<4x256xf32>
    %47 = tpu.matmul %46, %20, %cst_39 {dimension_numbers = #tpu.dot_dimension_numbers<[1], [0], [0], [1], [0, 0, 1, 1], [], []>} : vector<4x4xbf16>, vector<4x256xbf16>, vector<4x256xf32> -> vector<4x256xf32>
    %c2_40 = arith.constant 2 : index
    %c1_41 = arith.constant 1 : index
    %c0_42 = arith.constant 0 : index
    %c0_43 = arith.constant 0 : index
    %48 = vector.load %arg2[%c2_40, %c1_41, %c0_42, %c0_43] : memref<3x3x4x4xbf16, #tpu.memory_space<vmem>>, vector<1x1x4x4xbf16>
    %49 = vector.shape_cast %48 : vector<1x1x4x4xbf16> to vector<4x4xbf16>
    %cst_44 = arith.constant dense<0.000000e+00> : vector<4x256xf32>
    %50 = tpu.matmul %49, %21, %cst_44 {dimension_numbers = #tpu.dot_dimension_numbers<[1], [0], [0], [1], [0, 0, 1, 1], [], []>} : vector<4x4xbf16>, vector<4x256xbf16>, vector<4x256xf32> -> vector<4x256xf32>
    %51 = arith.addf %47, %50 : vector<4x256xf32>
    %c2_45 = arith.constant 2 : index
    %c2_46 = arith.constant 2 : index
    %c0_47 = arith.constant 0 : index
    %c0_48 = arith.constant 0 : index
    %52 = vector.load %arg2[%c2_45, %c2_46, %c0_47, %c0_48] : memref<3x3x4x4xbf16, #tpu.memory_space<vmem>>, vector<1x1x4x4xbf16>
    %53 = vector.shape_cast %52 : vector<1x1x4x4xbf16> to vector<4x4xbf16>
    %cst_49 = arith.constant dense<0.000000e+00> : vector<4x256xf32>
    %54 = tpu.matmul %53, %22, %cst_49 {dimension_numbers = #tpu.dot_dimension_numbers<[1], [0], [0], [1], [0, 0, 1, 1], [], []>} : vector<4x4xbf16>, vector<4x256xbf16>, vector<4x256xf32> -> vector<4x256xf32>
    %55 = arith.addf %51, %54 : vector<4x256xf32>
    %c240_i32 = arith.constant 240 : i32
    %56 = tpu.dynamic_rotate %33 by %c240_i32 dim 1 : vector<4x256xf32>, i32 -> vector<4x256xf32>
    %c16_i32 = arith.constant 16 : i32
    %57 = tpu.dynamic_rotate %33 by %c16_i32 dim 1 : vector<4x256xf32>, i32 -> vector<4x256xf32>
    %58 = vector.shape_cast %9 : vector<1x256xi1> to vector<1x256xi1>
    %59 = vector.broadcast %58 : vector<1x256xi1> to vector<4x256xi1>
    %60 = arith.select %59, %56, %57 : vector<4x256xi1>, vector<4x256xf32>
    %c16_i32_50 = arith.constant 16 : i32
    %61 = tpu.dynamic_rotate %55 by %c16_i32_50 dim 1 : vector<4x256xf32>, i32 -> vector<4x256xf32>
    %c240_i32_51 = arith.constant 240 : i32
    %62 = tpu.dynamic_rotate %55 by %c240_i32_51 dim 1 : vector<4x256xf32>, i32 -> vector<4x256xf32>
    %63 = vector.shape_cast %11 : vector<1x256xi1> to vector<1x256xi1>
    %64 = vector.broadcast %63 : vector<1x256xi1> to vector<4x256xi1>
    %65 = arith.select %64, %61, %62 : vector<4x256xi1>, vector<4x256xf32>
    %66 = arith.addf %60, %44 : vector<4x256xf32>
    %67 = arith.addf %66, %65 : vector<4x256xf32>
    %cst_52 = arith.constant dense<0.000000e+00> : vector<4xf32>
    %68 = vector.multi_reduction <add>, %67, %cst_52 [1] : vector<4x256xf32> to vector<4xf32>
    %69 = vector.shape_cast %68 : vector<4xf32> to vector<4x1xf32>
    %cst_53 = arith.constant 2.560000e+02 : f32
    %70 = vector.broadcast %cst_53 : f32 to vector<4x1xf32>
    %71 = arith.divf %69, %70 : vector<4x1xf32>
    %72 = arith.mulf %67, %67 : vector<4x256xf32>
    %cst_54 = arith.constant dense<0.000000e+00> : vector<4xf32>
    %73 = vector.multi_reduction <add>, %72, %cst_54 [1] : vector<4x256xf32> to vector<4xf32>
    %74 = vector.shape_cast %73 : vector<4xf32> to vector<4x1xf32>
    %cst_55 = arith.constant 2.560000e+02 : f32
    %75 = vector.broadcast %cst_55 : f32 to vector<4x1xf32>
    %76 = arith.divf %74, %75 : vector<4x1xf32>
    %77 = arith.mulf %71, %71 : vector<4x1xf32>
    %78 = arith.subf %76, %77 : vector<4x1xf32>
    %79 = vector.broadcast %71 : vector<4x1xf32> to vector<4x256xf32>
    %80 = arith.subf %67, %79 : vector<4x256xf32>
    %cst_56 = arith.constant 9.99999974E-6 : f32
    %81 = vector.broadcast %cst_56 : f32 to vector<4x1xf32>
    %82 = arith.addf %78, %81 : vector<4x1xf32>
    %83 = math.rsqrt %82 : vector<4x1xf32>
    %84 = vector.broadcast %83 : vector<4x1xf32> to vector<4x256xf32>
    %85 = arith.mulf %80, %84 : vector<4x256xf32>
    %cst_57 = arith.constant 0.000000e+00 : f32
    %86 = vector.broadcast %cst_57 : f32 to vector<4x256xf32>
    %87 = arith.maximumf %85, %86 : vector<4x256xf32>
    %c255_i32_58 = arith.constant 255 : i32
    %88 = tpu.dynamic_rotate %87 by %c255_i32_58 dim 1 : vector<4x256xf32>, i32 -> vector<4x256xf32>
    %c1_i32_59 = arith.constant 1 : i32
    %89 = tpu.dynamic_rotate %87 by %c1_i32_59 dim 1 : vector<4x256xf32>, i32 -> vector<4x256xf32>
    %90 = vector.shape_cast %7 : vector<1x256xi1> to vector<1x256xi1>
    %91 = vector.broadcast %90 : vector<1x256xi1> to vector<4x256xi1>
    %92 = arith.select %91, %89, %88 : vector<4x256xi1>, vector<4x256xf32>
    %93 = vector.shape_cast %5 : vector<1x256xi1> to vector<1x256xi1>
    %94 = vector.broadcast %93 : vector<1x256xi1> to vector<4x256xi1>
    %95 = arith.select %94, %88, %89 : vector<4x256xi1>, vector<4x256xf32>
    %96 = arith.truncf %95 : vector<4x256xf32> to vector<4x256xbf16>
    %97 = arith.truncf %87 : vector<4x256xf32> to vector<4x256xbf16>
    %98 = arith.truncf %92 : vector<4x256xf32> to vector<4x256xbf16>
    %c0_60 = arith.constant 0 : index
    %c0_61 = arith.constant 0 : index
    %c0_62 = arith.constant 0 : index
    %c0_63 = arith.constant 0 : index
    %99 = vector.load %arg3[%c0_60, %c0_61, %c0_62, %c0_63] : memref<3x3x4x4xbf16, #tpu.memory_space<vmem>>, vector<1x1x4x4xbf16>
    %100 = vector.shape_cast %99 : vector<1x1x4x4xbf16> to vector<4x4xbf16>
    %cst_64 = arith.constant dense<0.000000e+00> : vector<4x256xf32>
    %101 = tpu.matmul %100, %96, %cst_64 {dimension_numbers = #tpu.dot_dimension_numbers<[1], [0], [0], [1], [0, 0, 1, 1], [], []>} : vector<4x4xbf16>, vector<4x256xbf16>, vector<4x256xf32> -> vector<4x256xf32>
    %c0_65 = arith.constant 0 : index
    %c1_66 = arith.constant 1 : index
    %c0_67 = arith.constant 0 : index
    %c0_68 = arith.constant 0 : index
    %102 = vector.load %arg3[%c0_65, %c1_66, %c0_67, %c0_68] : memref<3x3x4x4xbf16, #tpu.memory_space<vmem>>, vector<1x1x4x4xbf16>
    %103 = vector.shape_cast %102 : vector<1x1x4x4xbf16> to vector<4x4xbf16>
    %cst_69 = arith.constant dense<0.000000e+00> : vector<4x256xf32>
    %104 = tpu.matmul %103, %97, %cst_69 {dimension_numbers = #tpu.dot_dimension_numbers<[1], [0], [0], [1], [0, 0, 1, 1], [], []>} : vector<4x4xbf16>, vector<4x256xbf16>, vector<4x256xf32> -> vector<4x256xf32>
    %105 = arith.addf %101, %104 : vector<4x256xf32>
    %c0_70 = arith.constant 0 : index
    %c2_71 = arith.constant 2 : index
    %c0_72 = arith.constant 0 : index
    %c0_73 = arith.constant 0 : index
    %106 = vector.load %arg3[%c0_70, %c2_71, %c0_72, %c0_73] : memref<3x3x4x4xbf16, #tpu.memory_space<vmem>>, vector<1x1x4x4xbf16>
    %107 = vector.shape_cast %106 : vector<1x1x4x4xbf16> to vector<4x4xbf16>
    %cst_74 = arith.constant dense<0.000000e+00> : vector<4x256xf32>
    %108 = tpu.matmul %107, %98, %cst_74 {dimension_numbers = #tpu.dot_dimension_numbers<[1], [0], [0], [1], [0, 0, 1, 1], [], []>} : vector<4x4xbf16>, vector<4x256xbf16>, vector<4x256xf32> -> vector<4x256xf32>
    %109 = arith.addf %105, %108 : vector<4x256xf32>
    %c1_75 = arith.constant 1 : index
    %c0_76 = arith.constant 0 : index
    %c0_77 = arith.constant 0 : index
    %c0_78 = arith.constant 0 : index
    %110 = vector.load %arg3[%c1_75, %c0_76, %c0_77, %c0_78] : memref<3x3x4x4xbf16, #tpu.memory_space<vmem>>, vector<1x1x4x4xbf16>
    %111 = vector.shape_cast %110 : vector<1x1x4x4xbf16> to vector<4x4xbf16>
    %cst_79 = arith.constant dense<0.000000e+00> : vector<4x256xf32>
    %112 = tpu.matmul %111, %96, %cst_79 {dimension_numbers = #tpu.dot_dimension_numbers<[1], [0], [0], [1], [0, 0, 1, 1], [], []>} : vector<4x4xbf16>, vector<4x256xbf16>, vector<4x256xf32> -> vector<4x256xf32>
    %c1_80 = arith.constant 1 : index
    %c1_81 = arith.constant 1 : index
    %c0_82 = arith.constant 0 : index
    %c0_83 = arith.constant 0 : index
    %113 = vector.load %arg3[%c1_80, %c1_81, %c0_82, %c0_83] : memref<3x3x4x4xbf16, #tpu.memory_space<vmem>>, vector<1x1x4x4xbf16>
    %114 = vector.shape_cast %113 : vector<1x1x4x4xbf16> to vector<4x4xbf16>
    %cst_84 = arith.constant dense<0.000000e+00> : vector<4x256xf32>
    %115 = tpu.matmul %114, %97, %cst_84 {dimension_numbers = #tpu.dot_dimension_numbers<[1], [0], [0], [1], [0, 0, 1, 1], [], []>} : vector<4x4xbf16>, vector<4x256xbf16>, vector<4x256xf32> -> vector<4x256xf32>
    %116 = arith.addf %112, %115 : vector<4x256xf32>
    %c1_85 = arith.constant 1 : index
    %c2_86 = arith.constant 2 : index
    %c0_87 = arith.constant 0 : index
    %c0_88 = arith.constant 0 : index
    %117 = vector.load %arg3[%c1_85, %c2_86, %c0_87, %c0_88] : memref<3x3x4x4xbf16, #tpu.memory_space<vmem>>, vector<1x1x4x4xbf16>
    %118 = vector.shape_cast %117 : vector<1x1x4x4xbf16> to vector<4x4xbf16>
    %cst_89 = arith.constant dense<0.000000e+00> : vector<4x256xf32>
    %119 = tpu.matmul %118, %98, %cst_89 {dimension_numbers = #tpu.dot_dimension_numbers<[1], [0], [0], [1], [0, 0, 1, 1], [], []>} : vector<4x4xbf16>, vector<4x256xbf16>, vector<4x256xf32> -> vector<4x256xf32>
    %120 = arith.addf %116, %119 : vector<4x256xf32>
    %c2_90 = arith.constant 2 : index
    %c0_91 = arith.constant 0 : index
    %c0_92 = arith.constant 0 : index
    %c0_93 = arith.constant 0 : index
    %121 = vector.load %arg3[%c2_90, %c0_91, %c0_92, %c0_93] : memref<3x3x4x4xbf16, #tpu.memory_space<vmem>>, vector<1x1x4x4xbf16>
    %122 = vector.shape_cast %121 : vector<1x1x4x4xbf16> to vector<4x4xbf16>
    %cst_94 = arith.constant dense<0.000000e+00> : vector<4x256xf32>
    %123 = tpu.matmul %122, %96, %cst_94 {dimension_numbers = #tpu.dot_dimension_numbers<[1], [0], [0], [1], [0, 0, 1, 1], [], []>} : vector<4x4xbf16>, vector<4x256xbf16>, vector<4x256xf32> -> vector<4x256xf32>
    %c2_95 = arith.constant 2 : index
    %c1_96 = arith.constant 1 : index
    %c0_97 = arith.constant 0 : index
    %c0_98 = arith.constant 0 : index
    %124 = vector.load %arg3[%c2_95, %c1_96, %c0_97, %c0_98] : memref<3x3x4x4xbf16, #tpu.memory_space<vmem>>, vector<1x1x4x4xbf16>
    %125 = vector.shape_cast %124 : vector<1x1x4x4xbf16> to vector<4x4xbf16>
    %cst_99 = arith.constant dense<0.000000e+00> : vector<4x256xf32>
    %126 = tpu.matmul %125, %97, %cst_99 {dimension_numbers = #tpu.dot_dimension_numbers<[1], [0], [0], [1], [0, 0, 1, 1], [], []>} : vector<4x4xbf16>, vector<4x256xbf16>, vector<4x256xf32> -> vector<4x256xf32>
    %127 = arith.addf %123, %126 : vector<4x256xf32>
    %c2_100 = arith.constant 2 : index
    %c2_101 = arith.constant 2 : index
    %c0_102 = arith.constant 0 : index
    %c0_103 = arith.constant 0 : index
    %128 = vector.load %arg3[%c2_100, %c2_101, %c0_102, %c0_103] : memref<3x3x4x4xbf16, #tpu.memory_space<vmem>>, vector<1x1x4x4xbf16>
    %129 = vector.shape_cast %128 : vector<1x1x4x4xbf16> to vector<4x4xbf16>
    %cst_104 = arith.constant dense<0.000000e+00> : vector<4x256xf32>
    %130 = tpu.matmul %129, %98, %cst_104 {dimension_numbers = #tpu.dot_dimension_numbers<[1], [0], [0], [1], [0, 0, 1, 1], [], []>} : vector<4x4xbf16>, vector<4x256xbf16>, vector<4x256xf32> -> vector<4x256xf32>
    %131 = arith.addf %127, %130 : vector<4x256xf32>
    %c240_i32_105 = arith.constant 240 : i32
    %132 = tpu.dynamic_rotate %109 by %c240_i32_105 dim 1 : vector<4x256xf32>, i32 -> vector<4x256xf32>
    %c16_i32_106 = arith.constant 16 : i32
    %133 = tpu.dynamic_rotate %109 by %c16_i32_106 dim 1 : vector<4x256xf32>, i32 -> vector<4x256xf32>
    %134 = vector.shape_cast %9 : vector<1x256xi1> to vector<1x256xi1>
    %135 = vector.broadcast %134 : vector<1x256xi1> to vector<4x256xi1>
    %136 = arith.select %135, %132, %133 : vector<4x256xi1>, vector<4x256xf32>
    %c16_i32_107 = arith.constant 16 : i32
    %137 = tpu.dynamic_rotate %131 by %c16_i32_107 dim 1 : vector<4x256xf32>, i32 -> vector<4x256xf32>
    %c240_i32_108 = arith.constant 240 : i32
    %138 = tpu.dynamic_rotate %131 by %c240_i32_108 dim 1 : vector<4x256xf32>, i32 -> vector<4x256xf32>
    %139 = vector.shape_cast %11 : vector<1x256xi1> to vector<1x256xi1>
    %140 = vector.broadcast %139 : vector<1x256xi1> to vector<4x256xi1>
    %141 = arith.select %140, %137, %138 : vector<4x256xi1>, vector<4x256xf32>
    %142 = arith.addf %136, %120 : vector<4x256xf32>
    %143 = arith.addf %142, %141 : vector<4x256xf32>
    %cst_109 = arith.constant dense<0.000000e+00> : vector<4xf32>
    %144 = vector.multi_reduction <add>, %143, %cst_109 [1] : vector<4x256xf32> to vector<4xf32>
    %145 = vector.shape_cast %144 : vector<4xf32> to vector<4x1xf32>
    %cst_110 = arith.constant 2.560000e+02 : f32
    %146 = vector.broadcast %cst_110 : f32 to vector<4x1xf32>
    %147 = arith.divf %145, %146 : vector<4x1xf32>
    %148 = arith.mulf %143, %143 : vector<4x256xf32>
    %cst_111 = arith.constant dense<0.000000e+00> : vector<4xf32>
    %149 = vector.multi_reduction <add>, %148, %cst_111 [1] : vector<4x256xf32> to vector<4xf32>
    %150 = vector.shape_cast %149 : vector<4xf32> to vector<4x1xf32>
    %cst_112 = arith.constant 2.560000e+02 : f32
    %151 = vector.broadcast %cst_112 : f32 to vector<4x1xf32>
    %152 = arith.divf %150, %151 : vector<4x1xf32>
    %153 = arith.mulf %147, %147 : vector<4x1xf32>
    %154 = arith.subf %152, %153 : vector<4x1xf32>
    %155 = vector.broadcast %147 : vector<4x1xf32> to vector<4x256xf32>
    %156 = arith.subf %143, %155 : vector<4x256xf32>
    %cst_113 = arith.constant 9.99999974E-6 : f32
    %157 = vector.broadcast %cst_113 : f32 to vector<4x1xf32>
    %158 = arith.addf %154, %157 : vector<4x1xf32>
    %159 = math.rsqrt %158 : vector<4x1xf32>
    %160 = vector.broadcast %159 : vector<4x1xf32> to vector<4x256xf32>
    %161 = arith.mulf %156, %160 : vector<4x256xf32>
    %162 = arith.addf %1, %161 : vector<4x256xf32>
    %c0_114 = arith.constant 0 : index
    %c0_115 = arith.constant 0 : index
    %c0_116 = arith.constant 0 : index
    %163 = vector.load %arg6[%c0_114, %c0_115, %c0_116] : memref<1x4x256xf32, #tpu.memory_space<vmem>>, vector<1x4x256xf32>
    %164 = vector.shape_cast %163 : vector<1x4x256xf32> to vector<4x256xf32>
    %165 = vector.shape_cast %162 : vector<4x256xf32> to vector<1x4x256xf32>
    tpu.vector_store %arg6[%c0_114, %c0_115, %c0_116], %165 {strides = array<i32>} : memref<1x4x256xf32, #tpu.memory_space<vmem>>, vector<1x4x256xf32>,
    return
  }
  func.func @transform_0(%arg0: i32) -> (i32, i32, i32) {
    %c0_i32 = arith.constant 0 : i32
    %c0_i32_0 = arith.constant 0 : i32
    %c0_i32_1 = arith.constant 0 : i32
    return %arg0, %c0_i32, %c0_i32_0 : i32, i32, i32
  }
  func.func @transform_1(%arg0: i32) -> (i32, i32, i32, i32) {
    %c0_i32 = arith.constant 0 : i32
    %c0_i32_0 = arith.constant 0 : i32
    %c0_i32_1 = arith.constant 0 : i32
    %c0_i32_2 = arith.constant 0 : i32
    %c0_i32_3 = arith.constant 0 : i32
    return %c0_i32, %c0_i32_0, %c0_i32_1, %c0_i32_2 : i32, i32, i32, i32
  }
  func.func @transform_2(%arg0: i32) -> (i32, i32, i32, i32) {
    %c0_i32 = arith.constant 0 : i32
    %c0_i32_0 = arith.constant 0 : i32
    %c0_i32_1 = arith.constant 0 : i32
    %c0_i32_2 = arith.constant 0 : i32
    %c0_i32_3 = arith.constant 0 : i32
    return %c0_i32, %c0_i32_0, %c0_i32_1, %c0_i32_2 : i32, i32, i32, i32
  }
  func.func @transform_3(%arg0: i32) -> (i32, i32) {
    %c0_i32 = arith.constant 0 : i32
    %c0_i32_0 = arith.constant 0 : i32
    %c0_i32_1 = arith.constant 0 : i32
    return %c0_i32, %c0_i32_0 : i32, i32
  }
  func.func @transform_4(%arg0: i32) -> (i32, i32) {
    %c0_i32 = arith.constant 0 : i32
    %c0_i32_0 = arith.constant 0 : i32
    %c0_i32_1 = arith.constant 0 : i32
    return %c0_i32, %c0_i32_0 : i32, i32
  }
  func.func @transform_5(%arg0: i32) -> (i32, i32, i32) {
    %c0_i32 = arith.constant 0 : i32
    %c0_i32_0 = arith.constant 0 : i32
    %c0_i32_1 = arith.constant 0 : i32
    return %arg0, %c0_i32, %c0_i32_0 : i32, i32, i32
  }
}

</mosaic_0001>

<bundles_post_ra>
// kernel: tpu_custom_call.1
= control target key start
LH: loop header
LB: loop body
LE: loop exit
PB: predicated region body
PF: predicated region fallthrough
CT: control target
= control target key end

     0   :  { %10 = vsyncpa [#allocation3], 0  ;;  %s2519_s0 = inlined_call_operand.hbm [shape: f32[2,4,256], index: 0, kind: input, shape index: {}]   ;;  %s2520_s1 = inlined_call_operand.hbm [shape: bf16[3,3,4,4], index: 1, kind: input, shape index: {}]   ;;  %s2521_s2 = inlined_call_operand.hbm [shape: bf16[3,3,4,4], index: 2, kind: input, shape index: {}]   ;;  %s2522_s3 = inlined_call_operand.hbm [shape: s32[1,256], index: 3, kind: input, shape index: {}]   ;;  %s2523_s4 = inlined_call_operand.hbm [shape: s32[1,256], index: 4, kind: input, shape index: {}]   ;;  %s2524_s5 = inlined_call_operand.hbm [shape: f32[2,4,256], index: 5, kind: output, shape index: {}]  }
   0x1   :  { %12 = vsyncpa [#allocation3 + $0x1], 0 }
   0x2   :  { %13 = vsyncpa [#allocation6], 0 }
   0x3   :  { %14 = vsyncpa [#allocation9], 0 }
   0x4   :  { %15 = vsyncpa [#allocation4], 0 }
   0x5   :  { %17 = vsyncpa [#allocation4 + $0x1], 0  ;;  %s1989_s18 = smov 0   ;;  %s1991_s19 = smov 0  }
   0x6   :  { %s1993_s20 = smov 0   ;;  %s1995_s21 = smov 0  }
   0x7 LB: > { %s1946_s22 = smov [#allocation5]   ;;  %s2010_s24 = sadd.s32 4294967295, %s1944_s21   ;;  %s1944_s21 = sphi %s1995_s21, %s2564_s21   ;;  %s1940_s20 = sphi %s1993_s20, %s2563_s20   ;;  %s1936_s19 = sphi %s1991_s19, %s2562_s19   ;;  %s1932_s18 = sphi %s1989_s18, %s2561_s18  }
   0x8   : > { %s176_s23 = sshll.u32 %s1946_s22, 4  ;;  %p1518_p0 = scmp.ge.s32.totalorder %s1944_s21, 1  ;;  %s2015_s23 = int_to_ptr.vmem [resolvable:$true] %s176_s23 }
   0x9   : > { %p2525_p1 = scmp.eq.s32.totalorder %s2010_s24, 0  ;;  %p164_p2 = scmp.lt.s32.totalorder %s1944_s21, 3 }
   0xa   : > { %s1947_s26 = smov [#allocation8]   ;;  %s1948_s29 = smov [#allocation7]  }
   0xb   : > { %p2017_p3 = pnand %p1518_p0, %p164_p2  ;;  %s203_s27 = sshll.u32 %s1947_s26, 4  ;;  %s2030_s27 = int_to_ptr.vmem [resolvable:$true] %s203_s27 }
   0xc   : > { %s189_s30 = sshll.u32 %s1948_s29, 4  ;;  %s1728_s8 = scalar_lea.hbm %s2520_s1, 288  ;;  %s2032_s30 = int_to_ptr.vmem [resolvable:$true] %s189_s30 }
   0xd   : > { %s2528_s25 = scalar_select %p2017_p3, 1, 0 }
   0xe   : > { %p1629_p5 = pneg %p2017_p3  ;;  %p1729_p7 = scmp.ne.s32.totalorder %s2520_s1, %s1728_s8 }
   0xf   : > { %p1735_p11 = scmp.lt.u32.totalorder %s1728_s8, %s2520_s1 }
  0x10   : > { %p2026_p6 = pnand %p1629_p5, %p2525_p1 }
  0x12   : > { %p2042_p8 = pneg %p2026_p6 }
  0x14   : > { %p1731_p9 = pnand %p2042_p8, %p1729_p7 }
  0x16   : > { %p1732_p10 = pneg %p1731_p9 }
  0x18   : > { %p1737_p12 = pnand %p1735_p11, %p1732_p10 }
  0x1a   : > { %1740 = shalt.err (!%p1737_p12)
}
  0x1b   : > { %s1741_s14 = scalar_lea.vmem %s2015_s23, 288  ;;  %p1749_p5 = scmp.lt.s32.totalorder %s2015_s23, %s2015_s23 }
  0x1c   : > { %p1742_p13 = scmp.ne.s32.totalorder %s2015_s23, %s1741_s14  ;;  %p1750_p4 = scmp.lt.s32.totalorder %s1741_s14, %s1741_s14 }
  0x1e   : > { %p1744_p0 = pnand %p1742_p13, %p2042_p8  ;;  %p1751_p7 = por %p1750_p4, %p1749_p5 }
  0x20   : > { %p1745_p2 = pneg %p1744_p0 }
  0x22   : > { %p1752_p9 = pnand %p1751_p7, %p1745_p2 }
  0x24   : > { %1755 = shalt.err (!%p1752_p9)
}
  0x25   : > { %s1949_s15 = smov 32   ;;  %s1950_s16 = smov 2  }
  0x26   : > { %1632 = dma.hbm_to_vmem [thread:$0]  (!%p2026_p6), %s2520_s1, 288, %s2015_s23, [#allocation6], %s1949_s15, %s1949_s15, %s1950_s16  }
  0x27   : > { %s1756_s6 = scalar_lea.hbm %s2522_s3, 32 }
  0x28   : > { %p1757_p4 = scmp.ne.s32.totalorder %s2522_s3, %s1756_s6  ;;  %p1763_p12 = scmp.lt.u32.totalorder %s1756_s6, %s2522_s3 }
  0x2a   : > { %p1759_p10 = pnand %p1757_p4, %p2042_p8 }
  0x2c   : > { %p1760_p11 = pneg %p1759_p10 }
  0x2e   : > { %p1765_p13 = pnand %p1763_p12, %p1760_p11 }
  0x30   : > { %1768 = shalt.err (!%p1765_p13)
}
  0x31   : > { %s1769_s23 = scalar_lea.vmem %s2030_s27, 32  ;;  %p1777_p7 = scmp.lt.s32.totalorder %s2030_s27, %s2030_s27 }
  0x32   : > { %p1770_p0 = scmp.ne.s32.totalorder %s2030_s27, %s1769_s23  ;;  %p1778_p9 = scmp.lt.s32.totalorder %s1769_s23, %s1769_s23 }
  0x34   : > { %p1772_p2 = pnand %p1770_p0, %p2042_p8  ;;  %p1779_p4 = por %p1778_p9, %p1777_p7 }
  0x36   : > { %p1773_p5 = pneg %p1772_p2 }
  0x38   : > { %p1780_p10 = pnand %p1779_p4, %p1773_p5 }
  0x3a   : > { %1783 = shalt.err (!%p1780_p10)
}
  0x3b   : > { %1638 = dma.hbm_to_vmem [thread:$0]  (!%p2026_p6), %s2522_s3, 32, %s2030_s27, [#allocation9]  }
  0x3c   : > { %s1784_s22 = scalar_lea.hbm %s2521_s2, 288 }
  0x3d   : > { %p1785_p11 = scmp.ne.s32.totalorder %s2521_s2, %s1784_s22  ;;  %p1791_p0 = scmp.lt.u32.totalorder %s1784_s22, %s2521_s2 }
  0x3f   : > { %p1787_p12 = pnand %p1785_p11, %p2042_p8 }
  0x41   : > { %p1788_p13 = pneg %p1787_p12 }
  0x43   : > { %p1793_p2 = pnand %p1791_p0, %p1788_p13 }
  0x45   : > { %1796 = shalt.err (!%p1793_p2)
}
  0x46   : > { %s1797_s27 = scalar_lea.vmem %s2032_s30, 288  ;;  %p1805_p4 = scmp.lt.s32.totalorder %s2032_s30, %s2032_s30 }
  0x47   : > { %p1798_p5 = scmp.ne.s32.totalorder %s2032_s30, %s1797_s27  ;;  %p1806_p10 = scmp.lt.s32.totalorder %s1797_s27, %s1797_s27 }
  0x49   : > { %p1800_p7 = pnand %p1798_p5, %p2042_p8  ;;  %p1807_p11 = por %p1806_p10, %p1805_p4 }
  0x4b   : > { %p1801_p9 = pneg %p1800_p7 }
  0x4d   : > { %p1808_p12 = pnand %p1807_p11, %p1801_p9 }
  0x4f   : > { %1811 = shalt.err (!%p1808_p12)
}
  0x50   : > { %1635 = dma.hbm_to_vmem [thread:$0]  (!%p2026_p6), %s2521_s2, 288, %s2032_s30, [#allocation6], %s1949_s15, %s1949_s15, %s1950_s16  }
  0x51   : > { %s1951_s10 = smov [#allocation10]   ;;  %s1812_s14 = scalar_lea.hbm %s2523_s4, 32 }
  0x52   : > { %s214_s23 = sshll.u32 %s1951_s10, 4  ;;  %p1813_p13 = scmp.ne.s32.totalorder %s2523_s4, %s1812_s14  ;;  %s215_s23 = int_to_ptr.vmem [resolvable:$true] %s214_s23 }
  0x53   : > { %p1819_p5 = scmp.lt.u32.totalorder %s1812_s14, %s2523_s4 }
  0x54   : > { %p1815_p0 = pnand %p1813_p13, %p2042_p8 }
  0x56   : > { %p1816_p2 = pneg %p1815_p0 }
  0x58   : > { %p1821_p7 = pnand %p1819_p5, %p1816_p2 }
  0x5a   : > { %1824 = shalt.err (!%p1821_p7)
}
  0x5b   : > { %s1825_s30 = scalar_lea.vmem %s215_s23, 32  ;;  %p1833_p11 = scmp.lt.s32.totalorder %s215_s23, %s215_s23 }
  0x5c   : > { %p1826_p9 = scmp.ne.s32.totalorder %s215_s23, %s1825_s30  ;;  %p1834_p12 = scmp.lt.s32.totalorder %s1825_s30, %s1825_s30 }
  0x5e   : > { %p1828_p4 = pnand %p1826_p9, %p2042_p8  ;;  %p1835_p1 = por %p1834_p12, %p1833_p11 }
  0x60   : > { %p1829_p10 = pneg %p1828_p4 }
  0x62   : > { %p1836_p3 = pnand %p1835_p1, %p1829_p10 }
  0x64   : > { %1839 = shalt.err (!%p1836_p3)
}
  0x65   : > { %1641 = dma.hbm_to_vmem [thread:$0]  (!%p2026_p6), %s2523_s4, 32, %s215_s23, [#allocation9]  }
  0x66   : > { %s1517_s11 = sadd.s32 4294967294, %s1944_s21   ;;  %s2135_s28 = sadd.s32 1, %s1944_s21  }
  0x67   : > { %s27_s6 = ssub.s32 %s1944_s21, %s2135_s28  ;;  %s30_s7 = sadd.s32 1, %s1940_s20 }
  0x68   : > { %p28_p1 = scmp.eq.s32.totalorder %s27_s6, 0  ;;  %p37_p3 = scmp.ne.s32.totalorder %s1940_s20, %s1936_s19 }
  0x69   : > { %p38_p8 = scmp.eq.s32.totalorder %s1944_s21, 0  ;;  %p43_p13 = scmp.ne.s32.totalorder %s1936_s19, %s1932_s18 }
  0x6a   : > { %s2146_s27 = scalar_select %p28_p1, %s1940_s20, %s30_s7  }
  0x6b   : > { %p2148_p0 = por %p38_p8, %p37_p3  ;;  %p2532_p2 = scmp.eq.s32.totalorder %s2010_s24, 0 }
  0x6c   : > { %p151_p5 = scmp.eq.s32.totalorder %s2010_s24, 1  ;;  %p157_p7 = scmp.eq.s32.totalorder %s1517_s11, 1 }
  0x6d   : > { %p2154_p6 = por %p2532_p2, %p43_p13  ;;  %p1654_p9 = scmp.lt.s32.totalorder %s1944_s21, 2 }
  0x6e   : > { %s225_s10 = sand.u32 1, %s1940_s20   ;;  %p2161_p4 = por %p151_p5, %p37_p3 }
  0x6f   : > { %p2165_p10 = por %p157_p7, %p43_p13  ;;  %s1524_s13 = sshll.u32 %s225_s10, 3 }
  0x70   : > { %s2534_s23 = scalar_select %p2161_p4, 1, 0 }
  0x71   : > { %s2535_s12 = scalar_select %p2165_p10, 1, 0 }
  0x72   : > { %s1575_s14 = sshll.u32 %s1944_s21, 7  ;;  %s229_s29 = scalar_lea.vmem [#allocation2], %s1524_s13 }
  0x73   : > { %s2173_s26 = scalar_lea.hbm %s2519_s0, %s1575_s14  ;;  %s237_s30 = sshll.u32 %s229_s29, 4  ;;  %s2175_s30 = int_to_ptr.vmem [resolvable:$true] %s237_s30 }
  0x74   : > { %p2179_p11 = pnand %p1654_p9, %p2148_p0  ;;  %s226_s16 = scalar_lea.sflag [#allocation3], %s225_s10 }
  0x75   : > { %s1840_s11 = scalar_lea.hbm %s2173_s26, 128  ;;  %s1845_s13 = scalar_lea.hbm %s2519_s0, 256 }
  0x76   : > { %p1841_p12 = scmp.ne.s32.totalorder %s2173_s26, %s1840_s11  ;;  %p1842_p1 = pneg %p2179_p11 }
  0x77   : > { %p1846_p13 = scmp.lt.u32.totalorder %s2173_s26, %s2519_s0  ;;  %p1847_p0 = scmp.lt.u32.totalorder %s1845_s13, %s1840_s11 }
  0x78   : > { %p1843_p3 = pnand %p1842_p1, %p1841_p12  ;;  %p1849_p5 = scmp.lt.u32.totalorder %s1840_s11, %s2173_s26 }
  0x79   : > { %p1848_p2 = por %p1847_p0, %p1846_p13 }
  0x7a   : > { %p1844_p8 = pneg %p1843_p3 }
  0x7b   : > { %p1850_p7 = por %p1849_p5, %p1848_p2 }
  0x7d   : > { %p1851_p9 = pnand %p1850_p7, %p1844_p8 }
  0x7f   : > { %1854 = shalt.err (!%p1851_p9)
}
  0x80   : > { %s1855_s10 = scalar_lea.vmem %s2175_s30, 128  ;;  %s1952_s17 = smov [#allocation2]  }
  0x81   : > { %p1856_p12 = scmp.ne.s32.totalorder %s2175_s30, %s1855_s10  ;;  %s1860_s22 = sshll.u32 %s1952_s17, 4  ;;  %s1861_s22 = int_to_ptr.vmem [resolvable:$false] %s1860_s22 }
  0x82   : > { %s1862_s29 = scalar_lea.vmem %s1861_s22, 256  ;;  %p1863_p4 = scmp.lt.s32.totalorder %s2175_s30, %s1861_s22 }
  0x83   : > { %p1858_p3 = pnand %p1856_p12, %p1842_p1  ;;  %p1864_p13 = scmp.lt.s32.totalorder %s1862_s29, %s1855_s10 }
  0x85   : > { %p1859_p10 = pneg %p1858_p3  ;;  %p1865_p0 = por %p1864_p13, %p1863_p4 }
  0x87   : > { %p1866_p2 = pnand %p1865_p0, %p1859_p10 }
  0x89   : > { %1869 = shalt.err (!%p1866_p2)
}
  0x8a   : > { %1645 = dma.hbm_to_vmem [thread:$0]  (!%p2179_p11), %s2173_s26, 128, %s2175_s30, %s226_s16  }
  0x8b   : > { %p2537_p8 = scmp.ne.s32.totalorder %s2528_s25, 0 }
  0x8c   : > { %s2211_s11 = sand.u32 (!%p2537_p8), 1, %s1936_s19  }
  0x8d   : > { %246 = sbr.rel (%p2537_p8) target bundleno = 1545 (0x609), region = 40  ;;  %s1528_s6 = sshll.u32 (!%p2537_p8), %s2211_s11, 3 }
  0x8e   : > { %s249_s7 = scalar_lea.sflag (!%p2537_p8), [#allocation3], %s2211_s11  ;;  %s252_s13 = scalar_lea.vmem (!%p2537_p8), [#allocation2], %s1528_s6 }
  0x94   : > { %1915 = dma.done.wait (%p2154_p6), %s249_s7, 128  }
  0x95   : > { %1917 = vsyncadd (%p2154_p6), %s249_s7, 4294967168  ;;  %p2538_p4 = scmp.eq.s32.totalorder %s2010_s24, 0 }
  0x97   : > { %1919 = dma.done.wait (%p2538_p4), [#allocation6], 576   ;;  %p2539_p10 = pmov %p2538_p4 }
  0x98   : > { %p2540_p11 = pmov %p2538_p4 }
  0x99   : > { %1921 = vsyncadd (%p2539_p10), [#allocation6], 4294966720 }
  0x9a   : > { %1923 = dma.done.wait (%p2540_p11), [#allocation9], 64   ;;  %p2541_p1 = pmov %p2538_p4 }
  0x9b   : > { %v1953_v0 = vmov 0   ;;  %v2231_v1 = vld [vmem:[%s252_s13] sm:$0xff]  ;;  %vm361_vm0 = vcmask 1041408   ;;  %s1954_s25 = smov 127   ;;  %v356_v7 = vld [vmem:[#allocation5 + $0x2] sm:$0x3]  ;;  %v310_v8 = vlaneseq }
  0x9c   : > { %1925 = vsyncadd (%p2541_p1), [#allocation9], 4294967232  ;;  %400 = vmatprep.mubr.bf16.mxu0 %v1953_v0  ;;  %596 = vmatprep.mubr.bf16.mxu1 %v1953_v0  ;;  %v304_v2 = vcombine.high %v2231_v1, %v2231_v1  ;;  %v350_v3 = vpack.c.bf16 %v2231_v1, %v2231_v1  ;;  %vm357_vm1 = vcmask 31744   ;;  %s1955_s9 = smov 1   ;;  %v297_v9 = vld [vmem:[#allocation8] sm:$0x3] }
  0x9d   : > { %v324_v10 = vshrl.u32 %v310_v8, 7  ;;  %vm299_vm2 = vcmp.eq.s32.totalorder %v297_v9, 0  ;;  %vm300_vm3 = vcmp.eq.s32.totalorder %v297_v9, 15  ;;  %v2256_v15 = vand.u32 127, %v310_v8  ;;  %v354_v43 = vld [vmem:[#allocation5] sm:$0x3] }
  0x9e   : > { %v1703_v4 = vpack.i.bf16 %v304_v2, %v2231_v1  ;;  %v2238_v5 = vpack.c.bf16 %v304_v2, %v304_v2  ;;  %v2241_v6 = vsel %vm361_vm0, %v350_v3, 0  ;;  %v335_v13 = vsel %vm299_vm2, 1, %v1953_v0  ;;  %v514_v44 = vld [vmem:[#allocation5 + $0x6] sm:$0x3]  ;;  %v606_v46 = vld [vmem:[#allocation5 + $0xa] sm:$0x3] }
  0x9f   : > { %v2250_v11 = vsub.s32 1, %v324_v10  ;;  %v2252_v12 = vsub.s32 0, %v324_v10  ;;  %v322_v14 = vsel %vm300_vm3, 1, %v1953_v0  ;;  %vm312_vm4 = vcmp.lt.s32.totalorder %v2256_v15, 127  ;;  %v460_v47 = vld [vmem:[#allocation5 + $0x4] sm:$0x3] }
  0xa0   : > { %1704 = vrot.lane.b32.xlu0 %v1703_v4, %s1954_s25  ;;  %1534 = vmatprep.subr.msk.bf16.mxu0 %vm361_vm0, %v2238_v5  ;;  %vm319_vm5 = vcmp.lt.s32.totalorder %v2256_v15, 1  ;;  %v516_v48 = vld [vmem:[#allocation5 + $0x8] sm:$0x3]  ;;  %v656_v49 = vld [vmem:[#allocation5 + $0xe] sm:$0x3]  ;;  %s1956_s26 = smov 16  }
  0xa1   : > { %369 = vmatpush1.bf16.msra.mxu0 %v2241_v6  ;;  %v343_v17 = vrot.slane %v335_v13, %v2250_v11  ;;  %v339_v18 = vrot.slane %v335_v13, %v2252_v12  ;;  %v330_v19 = vrot.slane %v322_v14, %v2250_v11  ;;  %v326_v20 = vrot.slane %v322_v14, %v2252_v12  ;;  %v654_v50 = vld [vmem:[#allocation5 + $0xc] sm:$0x3]  ;;  %v746_v51 = vld [vmem:[#allocation5 + $0x10] sm:$0x3]  ;;  %s1957_s30 = smov 112   ;;  %s1576_s15 = sshll.u32 %s2010_s24, 7 }
  0xa2   : > { %vm804_vm12 = vcmp.lt.s32.totalorder %v2256_v15, 16  ;;  %vm797_vm13 = vcmp.lt.s32.totalorder %v2256_v15, 112  ;;  %v897_v28 = vld [vmem:[#allocation7] sm:$0x3]  ;;  %v1147_v25 = vld [vmem:[#allocation7 + $0xa] sm:$0x3]  ;;  %s2475_s17 = scalar_lea.hbm %s2524_s5, %s1576_s15 }
  0xa3   : > { %vm2264_vm6 = vcmp.eq.s32.totalorder %v343_v17, 1  ;;  %vm2268_vm7 = vcmp.eq.s32.totalorder %v339_v18, 1  ;;  %vm2272_vm8 = vcmp.eq.s32.totalorder %v330_v19, 1  ;;  %vm2276_vm9 = vcmp.eq.s32.totalorder %v326_v20, 1  ;;  %v298_v18 = vld [vmem:[#allocation10] sm:$0x3] }
  0xa4   : > { %1709 = vrot.lane.b32.xlu0 %v1703_v4, %s1955_s9  ;;  %1535 = vmatmul.mubr.msk.bf16.vlgmr.msra.gmra.mrb[0].mxu0 %vm357_vm1, %v356_v7  ;;  %vm301_vm10 = vcmp.eq.s32.totalorder %v298_v18, 0  ;;  %vm302_vm11 = vcmp.eq.s32.totalorder %v298_v18, 15  ;;  %v1001_v29 = vld [vmem:[#allocation7 + $0x4] sm:$0x3]  ;;  %s294_s16 = scalar_lea.vmem [#allocation11], %s1528_s6  ;;  %s1395_s22 = scalar_lea.sflag [#allocation4], %s2211_s11 }
  0xa5   : > { %450 = vmatprep.mubr.bf16.mxu0 %v1953_v0  ;;  %v807_v20 = vsel %vm301_vm10, 1, %v1953_v0  ;;  %vm849_vm10 = vcmask 1043456   ;;  %s1409_s8 = sshll.u32 %s294_s16, 4  ;;  %p2558_p5 = scmp.ne.s32.totalorder %s2534_s23, 0  ;;  %s2477_s8 = int_to_ptr.vmem [resolvable:$true] %s1409_s8 }
  0xa6   : > { %s1870_s29 = scalar_lea.vmem %s2477_s8, 128  ;;  %s1958_s24 = smov [#allocation11]  }
  0xa7   : > { %p1871_p6 = scmp.ne.s32.totalorder %s2477_s8, %s1870_s29  ;;  %s1874_s6 = sshll.u32 %s1958_s24, 4  ;;  %s1875_s6 = int_to_ptr.vmem [resolvable:$false] %s1874_s6 }
  0xa8   : > { %s1876_s7 = scalar_lea.vmem %s1875_s6, 256  ;;  %p1877_p12 = scmp.lt.s32.totalorder %s2477_s8, %s1875_s6 }
  0xa9   : > { %p1872_p7 = pnand %p1871_p6, %p2558_p5  ;;  %p1878_p3 = scmp.lt.s32.totalorder %s1876_s7, %s1870_s29 }
  0xab   : > { %p1873_p9 = pneg %p1872_p7  ;;  %p1879_p13 = por %p1878_p3, %p1877_p12 }
  0xad   : > { %p1880_p0 = pnand %p1879_p13, %p1873_p9 }
 0x112   : > { %v1705_v16 = vpop.permute.xlu0 %1704 }
 0x113   : > { %v1707_v21 = vunpack.i.h.bf16 %v1705_v16  ;;  %v1706_v22 = vunpack.i.l.bf16 %v1705_v16 }
 0x115   : > { %v313_v30 = vsel %vm312_vm4, %v1706_v22, %v1707_v21  ;;  %v314_v31 = vsel %vm312_vm4, %v1707_v21, %v1706_v22  ;;  %v811_v21 = vrot.slane %v807_v20, %v2252_v12  ;;  %v815_v22 = vrot.slane %v807_v20, %v2250_v11 }
 0x116   : > { %v1710_v23 = vpop.permute.xlu0 %1709 }
 0x117   : > { %v1712_v26 = vunpack.i.h.bf16 %v1710_v23  ;;  %v1711_v27 = vunpack.i.l.bf16 %v1710_v23  ;;  %vm2340_vm14 = vcmp.eq.s32.totalorder %v811_v21, 1  ;;  %vm2344_vm15 = vcmp.eq.s32.totalorder %v815_v22, 1  ;;  %v899_v21 = vld [vmem:[#allocation7 + $0x2] sm:$0x3]  ;;  %v1057_v22 = vld [vmem:[#allocation7 + $0x8] sm:$0x3] }
 0x119   : > { %v320_v32 = vsel %vm319_vm5, %v1711_v27, %v1712_v26  ;;  %v321_v33 = vsel %vm319_vm5, %v1712_v26, %v1711_v27  ;;  %v832_v27 = vsel %vm302_vm11, 1, %v1953_v0 }
 0x11a   : > { %v347_v34 = vsel %vm2264_vm6, %v314_v31, %v320_v32  ;;  %v346_v35 = vsel %vm2268_vm7, %v313_v30, %v321_v33  ;;  %v334_v36 = vsel %vm2272_vm8, %v320_v32, %v314_v31  ;;  %v333_v37 = vsel %vm2276_vm9, %v321_v33, %v313_v30 }
 0x11b   : > { %v349_v38 = vpack.c.bf16 %v347_v34, %v347_v34  ;;  %v348_v39 = vpack.c.bf16 %v346_v35, %v346_v35  ;;  %v353_v41 = vpack.c.bf16 %v334_v36, %v334_v36  ;;  %v352_v42 = vpack.c.bf16 %v333_v37, %v333_v37 }
 0x11c   : > { %v836_v35 = vrot.slane %v832_v27, %v2252_v12  ;;  %v840_v36 = vrot.slane %v832_v27, %v2250_v11 }
 0x11d   : > { %1536 = vmatprep.subr.msk.bf16.mxu0 %vm361_vm0, %v349_v38  ;;  %1542 = vmatprep.subr.msk.bf16.mxu1 %vm361_vm0, %v349_v38  ;;  %v413_v40 = vsel %vm361_vm0, %v348_v39, 0  ;;  %v465_v45 = vsel %vm361_vm0, %v352_v42, 0 }
 0x11e   : > { %419 = vmatpush1.bf16.msra.mxu0 %v413_v40  ;;  %565 = vmatpush1.bf16.msra.mxu1 %v413_v40  ;;  %vm2362_vm2 = vcmp.eq.s32.totalorder %v836_v35, 1  ;;  %vm2366_vm3 = vcmp.eq.s32.totalorder %v840_v36, 1 }
 0x11f   : > { %1538 = vmatprep.subr.msk.bf16.mxu0 %vm361_vm0, %v353_v41  ;;  %1544 = vmatprep.subr.msk.bf16.mxu1 %vm361_vm0, %v353_v41 }
 0x121   : > { %1537 = vmatmul.mubr.msk.bf16.vlgmr.msra.gmra.mrb[0].mxu0 %vm357_vm1, %v354_v43  ;;  %1543 = vmatmul.mubr.msk.bf16.vlgmr.msra.gmra.mrb[0].mxu1 %vm357_vm1, %v514_v44 }
 0x122   : > { %471 = vmatpush1.bf16.msra.mxu0 %v465_v45  ;;  %611 = vmatpush1.bf16.msra.mxu1 %v465_v45 }
 0x123   : > { %502 = vmatprep.mubr.bf16.mxu0 %v1953_v0  ;;  %1540 = vmatprep.subr.msk.bf16.mxu0 %vm361_vm0, %v2238_v5 }
 0x124   : > { %642 = vmatprep.mubr.bf16.mxu1 %v1953_v0 }
 0x129   : > { %1545 = vmatmul.mubr.msk.bf16.vlgmr.msra.gmra.mrb[4].mxu1 %vm357_vm1, %v606_v46 }
 0x12a   : > { %941 = vmatprep.mubr.bf16.mxu1 %v1953_v0 }
 0x12d   : > { %1539 = vmatmul.mubr.msk.bf16.vlgmr.msra.gmra.mrb[0].mxu0 %vm357_vm1, %v460_v47 }
 0x12e   : > { %521 = vmatpush1.bf16.msra.mxu0 %v2241_v6  ;;  %552 = vmatprep.mubr.bf16.mxu0 %v1953_v0 }
 0x12f   : > { %1546 = vmatprep.subr.msk.bf16.mxu0 %vm361_vm0, %v2238_v5 }
 0x135   : > { %1541 = vmatmul.mubr.msk.bf16.vlgmr.msra.gmra.mrb[4].mxu0 %vm357_vm1, %v516_v48 }
 0x136   : > { %661 = vmatpush1.bf16.msra.mxu0 %v2241_v6  ;;  %692 = vmatprep.mubr.bf16.mxu0 %v1953_v0 }
 0x137   : > { %1548 = vmatprep.subr.msk.bf16.mxu0 %vm361_vm0, %v349_v38 }
 0x13d   : > { %1547 = vmatmul.mubr.msk.bf16.vlgmr.msra.gmra.mrb[8].mxu0 %vm357_vm1, %v656_v49 }
 0x13e   : > { %705 = vmatpush1.bf16.msra.mxu0 %v413_v40  ;;  %736 = vmatprep.mubr.bf16.mxu0 %v1953_v0 }
 0x13f   : > { %1550 = vmatprep.subr.msk.bf16.mxu0 %vm361_vm0, %v353_v41 }
 0x149   : > { %1549 = vmatmul.mubr.msk.bf16.vlgmr.msra.gmra.mrb[8].mxu0 %vm357_vm1, %v654_v50 }
 0x14a   : > { %751 = vmatpush1.bf16.msra.mxu0 %v465_v45  ;;  %782 = vmatprep.mubr.bf16.mxu0 %v1953_v0 }
 0x155   : > { %1551 = vmatmul.mubr.msk.bf16.vlgmr.msra.gmra.mrb[8].mxu0 %vm357_vm1, %v746_v51 }
 0x156   : > { %1093 = vmatprep.mubr.bf16.mxu0 %v1953_v0 }
 0x1f4   : > { %v598_v52 = vpop.f32.mrb[0].mxu1 }
 0x1f5   : > { %v600_v53 = vpop.f32.mrb[1].mxu1 }
 0x1f6   : > { %v602_v54 = vpop.f32.mrb[2].mxu1 }
 0x1f7   : > { %v603_v55 = vpop.f32.mrb[3].mxu1 }
 0x1fc   : > { %v644_v56 = vpop.f32.mrb[4].mxu1 }
 0x1fd   : > { %v646_v57 = vpop.f32.mrb[5].mxu1 }
 0x1fe   : > { %v648_v58 = vpop.f32.mrb[6].mxu1 }
 0x1ff   : > { %v649_v59 = vpop.f32.mrb[7].mxu1 }
 0x200   : > { %v504_v60 = vpop.f32.mrb[0].mxu0 }
 0x201   : > { %800 = vrot.lane.b32.xlu0 %v504_v60, %s1956_s26  ;;  %793 = vrot.lane.b32.xlu1 %v504_v60, %s1957_s30  ;;  %v506_v61 = vpop.f32.mrb[1].mxu0 }
 0x202   : > { %v508_v62 = vpop.f32.mrb[2].mxu0 }
 0x203   : > { %v509_v63 = vpop.f32.mrb[3].mxu0 }
 0x205   : > { %795 = vrot.lane.b32.xlu1 %v506_v61, %s1957_s30 }
 0x208   : > { %v554_v2 = vpop.f32.mrb[4].mxu0 }
 0x209   : > { %v599_v3 = vadd.f32 %v598_v52, %v554_v2  ;;  %802 = vrot.lane.b32.xlu1 %v506_v61, %s1956_s26  ;;  %v556_v4 = vpop.f32.mrb[5].mxu0 }
 0x20a   : > { %v601_v5 = vadd.f32 %v600_v53, %v556_v4  ;;  %v558_v6 = vpop.f32.mrb[6].mxu0 }
 0x20b   : > { %v651_v7 = vadd.f32 %v644_v56, %v599_v3  ;;  %v559_v8 = vpop.f32.mrb[7].mxu0 }
 0x20c   : > { %v652_v9 = vadd.f32 %v646_v57, %v601_v5 }
 0x228   : > { %v784_v10 = vpop.f32.mrb[8].mxu0 }
 0x229   : > { %820 = vrot.lane.b32.xlu0 %v784_v10, %s1956_s26  ;;  %v786_v13 = vpop.f32.mrb[9].mxu0 }
 0x22a   : > { %822 = vrot.lane.b32.xlu1 %v786_v13, %s1956_s26  ;;  %v788_v14 = vpop.f32.mrb[10].mxu0 }
 0x22b   : > { %v789_v16 = vpop.f32.mrb[11].mxu0 }
 0x22d   : > { %826 = vrot.lane.b32.xlu0 %v784_v10, %s1957_s30 }
 0x22e   : > { %828 = vrot.lane.b32.xlu1 %v786_v13, %s1957_s30 }
 0x273   : > { %v794_v17 = vpop.permute.xlu1 %793  ;;  %v801_v23 = vpop.permute.xlu0 %800 }
 0x277   : > { %v796_v19 = vpop.permute.xlu1 %795 }
 0x278   : > { %v798_v37 = vsel %vm797_vm13, %v794_v17, %v796_v19  ;;  %v799_v38 = vsel %vm797_vm13, %v796_v19, %v794_v17 }
 0x27b   : > { %v803_v26 = vpop.permute.xlu1 %802 }
 0x27c   : > { %v805_v32 = vsel %vm804_vm12, %v801_v23, %v803_v26  ;;  %v806_v33 = vsel %vm804_vm12, %v803_v26, %v801_v23 }
 0x27d   : > { %v818_v40 = vsel %vm2340_vm14, %v798_v37, %v806_v33  ;;  %v819_v41 = vsel %vm2344_vm15, %v799_v38, %v805_v32 }
 0x27e   : > { %v845_v12 = vadd.f32 %v818_v40, %v651_v7  ;;  %v846_v44 = vadd.f32 %v819_v41, %v652_v9 }
 0x29b   : > { %v821_v34 = vpop.permute.xlu0 %820 }
 0x29c   : > { %v823_v39 = vpop.permute.xlu1 %822 }
 0x29d   : > { %v824_v46 = vsel %vm804_vm12, %v821_v34, %v823_v39  ;;  %v825_v47 = vsel %vm804_vm12, %v823_v39, %v821_v34 }
 0x29f   : > { %v827_v42 = vpop.permute.xlu0 %826 }
 0x2a0   : > { %v829_v45 = vpop.permute.xlu1 %828 }
 0x2a1   : > { %v830_v48 = vsel %vm797_vm13, %v827_v42, %v829_v45  ;;  %v831_v49 = vsel %vm797_vm13, %v829_v45, %v827_v42 }
 0x2a2   : > { %v843_v50 = vsel %vm2362_vm2, %v825_v47, %v830_v48  ;;  %v844_v51 = vsel %vm2366_vm3, %v824_v46, %v831_v49  ;;  %v1055_v48 = vld [vmem:[#allocation7 + $0x6] sm:$0x3]  ;;  %v1197_v49 = vld [vmem:[#allocation7 + $0xe] sm:$0x3] }
 0x2a3   : > { %v847_v52 = vadd.f32 %v845_v12, %v843_v50  ;;  %v848_v53 = vadd.f32 %v846_v44, %v844_v51  ;;  %v1195_v50 = vld [vmem:[#allocation7 + $0xc] sm:$0x3]  ;;  %v1287_v51 = vld [vmem:[#allocation7 + $0x10] sm:$0x3] }
 0x2a5   : > { %v850_v54 = vsel %vm849_vm10, %v847_v52, 0.0  ;;  %v851_v55 = vsel %vm849_vm10, %v848_v53, 0.0  ;;  %v857_v56 = vmul.f32 %v847_v52, %v847_v52  ;;  %v858_v57 = vmul.f32 %v848_v53, %v848_v53 }
 0x2a6   : > { %v852_v58 = vadd.f32 %v851_v55, %v850_v54 }
 0x2a7   : > { %v859_v59 = vsel %vm849_vm10, %v857_v56, 0.0  ;;  %v860_v60 = vsel %vm849_vm10, %v858_v57, 0.0 }
 0x2a8   : > { %853 = vadd.xlane.f32.xlu0 %v852_v58  ;;  %v861_v61 = vadd.f32 %v860_v60, %v859_v59 }
 0x2aa   : > { %862 = vadd.xlane.f32.xlu1 %v861_v61 }
 0x335   : > { %v854_v62 = vpop.xlane.xlu0 %853 }
 0x336   : > { %v856_v63 = vmul.f32 0.00390625, %v854_v62 }
 0x337   : > { %v863_v2 = vpop.xlane.xlu1 %862 }
 0x338   : > { %v864_v3 = vmul.f32 0.00390625, %v863_v2  ;;  %v865_v4 = vmul.f32 %v856_v63, %v856_v63  ;;  %v867_v7 = vsub.f32 %v847_v52, %v856_v63  ;;  %v868_v8 = vsub.f32 %v848_v53, %v856_v63 }
 0x33a   : > { %v866_v5 = vsub.f32 %v864_v3, %v865_v4 }
 0x33c   : > { %v869_v6 = vadd.f32 1e-05, %v866_v5 }
 0x33e   : > { %1724 = vrsqrt.f32 %v869_v6 }
 0x348   : > { %v1725_v9 = vpop.eup %1724 }
 0x349   : > { %v872_v10 = vmul.f32 %v1725_v9, %v868_v8  ;;  %v871_v13 = vmul.f32 %v1725_v9, %v867_v7 }
 0x34b   : > { %v874_v14 = vmax.f32 %v872_v10, 0.0  ;;  %v873_v16 = vmax.f32 %v871_v13, 0.0 }
 0x34d   : > { %v894_v17 = vpack.c.bf16 %v874_v14, %v874_v14  ;;  %v1718_v18 = vpack.i.bf16 %v874_v14, %v873_v16  ;;  %v893_v19 = vpack.c.bf16 %v873_v16, %v873_v16 }
 0x34f   : > { %1552 = vmatprep.subr.msk.bf16.mxu1 %vm361_vm0, %v894_v17  ;;  %1558 = vmatprep.subr.msk.bf16.mxu0 %vm361_vm0, %v894_v17  ;;  %v904_v20 = vsel %vm361_vm0, %v893_v19, 0 }
 0x350   : > { %1719 = vrot.lane.b32.xlu1 %v1718_v18, %s1955_s9  ;;  %1714 = vrot.lane.b32.xlu0 %v1718_v18, %s1954_s25 }
 0x351   : > { %910 = vmatpush1.bf16.msra.mxu1 %v904_v20  ;;  %1062 = vmatpush1.bf16.msra.mxu0 %v904_v20 }
 0x354   : > { %1553 = vmatmul.mubr.msk.bf16.vlgmr.msra.gmra.mrb[8].mxu1 %vm357_vm1, %v899_v21  ;;  %1559 = vmatmul.mubr.msk.bf16.vlgmr.msra.gmra.mrb[12].mxu0 %vm357_vm1, %v1057_v22 }
 0x355   : > { %991 = vmatprep.mubr.bf16.mxu1 %v1953_v0  ;;  %1183 = vmatprep.mubr.bf16.mxu0 %v1953_v0 }
 0x3c2   : > { %v1720_v23 = vpop.permute.xlu1 %1719  ;;  %v1715_v26 = vpop.permute.xlu0 %1714 }
 0x3c3   : > { %v1722_v27 = vunpack.i.h.bf16 %v1720_v23  ;;  %v1721_v32 = vunpack.i.l.bf16 %v1720_v23  ;;  %v1717_v33 = vunpack.i.h.bf16 %v1715_v26  ;;  %v1716_v34 = vunpack.i.l.bf16 %v1715_v26 }
 0x3c5   : > { %v885_v35 = vsel %vm319_vm5, %v1721_v32, %v1722_v27  ;;  %v886_v36 = vsel %vm319_vm5, %v1722_v27, %v1721_v32  ;;  %v879_v37 = vsel %vm312_vm4, %v1716_v34, %v1717_v33  ;;  %v880_v38 = vsel %vm312_vm4, %v1717_v33, %v1716_v34 }
 0x3c6   : > { %v890_v39 = vsel %vm2264_vm6, %v880_v38, %v885_v35  ;;  %v888_v40 = vsel %vm2272_vm8, %v885_v35, %v880_v38  ;;  %v889_v41 = vsel %vm2268_vm7, %v879_v37, %v886_v36  ;;  %v887_v42 = vsel %vm2276_vm9, %v886_v36, %v879_v37 }
 0x3c7   : > { %v892_v12 = vpack.c.bf16 %v890_v39, %v890_v39  ;;  %v896_v44 = vpack.c.bf16 %v888_v40, %v888_v40  ;;  %v891_v45 = vpack.c.bf16 %v889_v41, %v889_v41  ;;  %v895_v46 = vpack.c.bf16 %v887_v42, %v887_v42 }
 0x3c9   : > { %1554 = vmatprep.subr.msk.bf16.mxu1 %vm361_vm0, %v892_v12  ;;  %1562 = vmatprep.subr.msk.bf16.mxu0 %vm361_vm0, %v896_v44  ;;  %v954_v24 = vsel %vm361_vm0, %v891_v45, 0  ;;  %v1006_v47 = vsel %vm361_vm0, %v895_v46, 0 }
 0x3ca   : > { %960 = vmatpush1.bf16.msra.mxu1 %v954_v24  ;;  %1152 = vmatpush1.bf16.msra.mxu0 %v1006_v47 }
 0x3cb   : > { %1556 = vmatprep.subr.msk.bf16.mxu1 %vm361_vm0, %v896_v44 }
 0x3cd   : > { %1555 = vmatmul.mubr.msk.bf16.vlgmr.msra.gmra.mrb[8].mxu1 %vm357_vm1, %v897_v28  ;;  %1563 = vmatmul.mubr.msk.bf16.vlgmr.msra.gmra.mrb[16].mxu0 %vm357_vm1, %v1147_v25 }
 0x3ce   : > { %1012 = vmatpush1.bf16.msra.mxu1 %v1006_v47  ;;  %1043 = vmatprep.mubr.bf16.mxu1 %v1953_v0 }
 0x3cf   : > { %1560 = vmatprep.subr.msk.bf16.mxu1 %vm361_vm0, %v892_v12 }
 0x3d9   : > { %1557 = vmatmul.mubr.msk.bf16.vlgmr.msra.gmra.mrb[8].mxu1 %vm357_vm1, %v1001_v29 }
 0x3da   : > { %1106 = vmatpush1.bf16.msra.mxu1 %v954_v24  ;;  %1137 = vmatprep.mubr.bf16.mxu1 %v1953_v0 }
 0x3db   : > { %1564 = vmatprep.subr.msk.bf16.mxu1 %vm361_vm0, %v894_v17 }
 0x3e1   : > { %1561 = vmatmul.mubr.msk.bf16.vlgmr.msra.gmra.mrb[12].mxu1 %vm357_vm1, %v1055_v48 }
 0x3e2   : > { %1202 = vmatpush1.bf16.msra.mxu1 %v904_v20  ;;  %1233 = vmatprep.mubr.bf16.mxu1 %v1953_v0 }
 0x3e3   : > { %1566 = vmatprep.subr.msk.bf16.mxu1 %vm361_vm0, %v892_v12 }
 0x3e9   : > { %1565 = vmatmul.mubr.msk.bf16.vlgmr.msra.gmra.mrb[16].mxu1 %vm357_vm1, %v1197_v49 }
 0x3ea   : > { %1246 = vmatpush1.bf16.msra.mxu1 %v954_v24  ;;  %1277 = vmatprep.mubr.bf16.mxu1 %v1953_v0 }
 0x3eb   : > { %1568 = vmatprep.subr.msk.bf16.mxu1 %vm361_vm0, %v896_v44 }
 0x3f5   : > { %1567 = vmatmul.mubr.msk.bf16.vlgmr.msra.gmra.mrb[16].mxu1 %vm357_vm1, %v1195_v50 }
 0x3f6   : > { %1292 = vmatpush1.bf16.msra.mxu1 %v1006_v47  ;;  %1323 = vmatprep.mubr.bf16.mxu1 %v1953_v0 }
 0x401   : > { %1569 = vmatmul.mubr.msk.bf16.vlgmr.msra.gmra.mrb[16].mxu1 %vm357_vm1, %v1287_v51 }
 0x427   : > { %v1095_v52 = vpop.f32.mrb[12].mxu0 }
 0x428   : > { %v1097_v53 = vpop.f32.mrb[13].mxu0 }
 0x429   : > { %v1099_v54 = vpop.f32.mrb[14].mxu0 }
 0x42a   : > { %v1100_v55 = vpop.f32.mrb[15].mxu0 }
 0x4a0   : > { %v1185_v56 = vpop.f32.mrb[16].mxu0 }
 0x4a1   : > { %v1187_v57 = vpop.f32.mrb[17].mxu0 }
 0x4a2   : > { %v1189_v58 = vpop.f32.mrb[18].mxu0 }
 0x4a3   : > { %v1190_v59 = vpop.f32.mrb[19].mxu0 }
 0x4ac   : > { %v1045_v60 = vpop.f32.mrb[8].mxu1 }
 0x4ad   : > { %1334 = vrot.lane.b32.xlu0 %v1045_v60, %s1957_s30  ;;  %v1047_v61 = vpop.f32.mrb[9].mxu1 }
 0x4ae   : > { %1336 = vrot.lane.b32.xlu1 %v1047_v61, %s1957_s30  ;;  %v1049_v62 = vpop.f32.mrb[10].mxu1 }
 0x4af   : > { %v1050_v63 = vpop.f32.mrb[11].mxu1 }
 0x4b1   : > { %1340 = vrot.lane.b32.xlu0 %v1045_v60, %s1956_s26 }
 0x4b2   : > { %1342 = vrot.lane.b32.xlu1 %v1047_v61, %s1956_s26 }
 0x4b4   : > { %v1139_v0 = vpop.f32.mrb[12].mxu1 }
 0x4b5   : > { %v1140_v2 = vadd.f32 %v1139_v0, %v1095_v52  ;;  %v1141_v3 = vpop.f32.mrb[13].mxu1 }
 0x4b6   : > { %v1142_v4 = vadd.f32 %v1141_v3, %v1097_v53  ;;  %v1143_v5 = vpop.f32.mrb[14].mxu1 }
 0x4b7   : > { %v1144_v6 = vpop.f32.mrb[15].mxu1  ;;  %v1192_v7 = vadd.f32 %v1185_v56, %v1140_v2 }
 0x4b8   : > { %v1193_v8 = vadd.f32 %v1187_v57, %v1142_v4 }
 0x4d4   : > { %v1325_v9 = vpop.f32.mrb[16].mxu1 }
 0x4d5   : > { %1348 = vrot.lane.b32.xlu0 %v1325_v9, %s1956_s26  ;;  %v1327_v10 = vpop.f32.mrb[17].mxu1 }
 0x4d6   : > { %1350 = vrot.lane.b32.xlu1 %v1327_v10, %s1956_s26  ;;  %v1329_v13 = vpop.f32.mrb[18].mxu1 }
 0x4d7   : > { %v1330_v14 = vpop.f32.mrb[19].mxu1 }
 0x4d9   : > { %1354 = vrot.lane.b32.xlu0 %v1325_v9, %s1957_s30 }
 0x4da   : > { %1356 = vrot.lane.b32.xlu1 %v1327_v10, %s1957_s30 }
 0x51f   : > { %v1335_v16 = vpop.permute.xlu0 %1334 }
 0x520   : > { %v1337_v17 = vpop.permute.xlu1 %1336 }
 0x521   : > { %v1338_v23 = vsel %vm797_vm13, %v1335_v16, %v1337_v17  ;;  %v1339_v26 = vsel %vm797_vm13, %v1337_v17, %v1335_v16 }
 0x523   : > { %v1341_v18 = vpop.permute.xlu0 %1340 }
 0x524   : > { %v1343_v19 = vpop.permute.xlu1 %1342 }
 0x525   : > { %v1344_v20 = vsel %vm804_vm12, %v1341_v18, %v1343_v19  ;;  %v1345_v21 = vsel %vm804_vm12, %v1343_v19, %v1341_v18 }
 0x526   : > { %v1346_v32 = vsel %vm2340_vm14, %v1338_v23, %v1345_v21  ;;  %v1347_v33 = vsel %vm2344_vm15, %v1339_v26, %v1344_v20 }
 0x527   : > { %v1362_v35 = vadd.f32 %v1346_v32, %v1192_v7  ;;  %v1363_v36 = vadd.f32 %v1347_v33, %v1193_v8 }
 0x547   : > { %v1349_v22 = vpop.permute.xlu0 %1348 }
 0x548   : > { %v1351_v27 = vpop.permute.xlu1 %1350 }
 0x549   : > { %v1352_v38 = vsel %vm804_vm12, %v1349_v22, %v1351_v27  ;;  %v1353_v39 = vsel %vm804_vm12, %v1351_v27, %v1349_v22 }
 0x54b   : > { %v1355_v34 = vpop.permute.xlu0 %1354 }
 0x54c   : > { %v1357_v37 = vpop.permute.xlu1 %1356 }
 0x54d   : > { %v1358_v40 = vsel %vm797_vm13, %v1355_v34, %v1357_v37  ;;  %v1359_v30 = vsel %vm797_vm13, %v1357_v37, %v1355_v34 }
 0x54e   : > { %v1360_v31 = vsel %vm2362_vm2, %v1353_v39, %v1358_v40  ;;  %v1361_v41 = vsel %vm2366_vm3, %v1352_v38, %v1359_v30 }
 0x54f   : > { %v1364_v42 = vadd.f32 %v1362_v35, %v1360_v31  ;;  %v1365_v12 = vadd.f32 %v1363_v36, %v1361_v41 }
 0x551   : > { %v1366_v44 = vsel %vm849_vm10, %v1364_v42, 0.0  ;;  %v1367_v45 = vsel %vm849_vm10, %v1365_v12, 0.0  ;;  %v1372_v46 = vmul.f32 %v1364_v42, %v1364_v42  ;;  %v1373_v24 = vmul.f32 %v1365_v12, %v1365_v12 }
 0x552   : > { %v1368_v47 = vadd.f32 %v1367_v45, %v1366_v44 }
 0x553   : > { %v1374_v28 = vsel %vm849_vm10, %v1372_v46, 0.0  ;;  %v1375_v15 = vsel %vm849_vm10, %v1373_v24, 0.0 }
 0x554   : > { %1369 = vadd.xlane.f32.xlu0 %v1368_v47  ;;  %v1376_v43 = vadd.f32 %v1375_v15, %v1374_v28 }
 0x556   : > { %1377 = vadd.xlane.f32.xlu1 %v1376_v43 }
 0x5e1   : > { %v1370_v11 = vpop.xlane.xlu0 %1369 }
 0x5e2   : > { %v1371_v25 = vmul.f32 0.00390625, %v1370_v11 }
 0x5e3   : > { %v1378_v29 = vpop.xlane.xlu1 %1377 }
 0x5e4   : > { %v1379_v48 = vmul.f32 0.00390625, %v1378_v29  ;;  %v1380_v49 = vmul.f32 %v1371_v25, %v1371_v25  ;;  %v1382_v52 = vsub.f32 %v1364_v42, %v1371_v25  ;;  %v1383_v53 = vsub.f32 %v1365_v12, %v1371_v25 }
 0x5e6   : > { %v1381_v50 = vsub.f32 %v1379_v48, %v1380_v49 }
 0x5e8   : > { %v1384_v51 = vadd.f32 1e-05, %v1381_v50 }
 0x5ea   : > { %1726 = vrsqrt.f32 %v1384_v51 }
 0x5f4   : > { %v1727_v54 = vpop.eup %1726 }
 0x5f5   : > { %v1386_v55 = vmul.f32 %v1727_v54, %v1382_v52  ;;  %v1387_v56 = vmul.f32 %v1727_v54, %v1383_v53 }
 0x5f7   : > { %v1390_v57 = vcombine.low %v1386_v55, %v1387_v56 }
 0x5f9   : > { %v1392_v58 = vadd.f32 %v1390_v57, %v2231_v1 }
 0x5fb   : > { %1393 = vst [vmem:[%s294_s16] sm:$0xff] %v1392_v58 }
 0x5fc   : > { %1883 = shalt.err (!%p1880_p0)
}
 0x5fd   : > { %s1884_s11 = scalar_lea.hbm %s2475_s17, 128  ;;  %s1888_s9 = scalar_lea.hbm %s2524_s5, 256 }
 0x5fe   : > { %p1885_p2 = scmp.ne.s32.totalorder %s2475_s17, %s1884_s11  ;;  %p1889_p10 = scmp.lt.u32.totalorder %s2475_s17, %s2524_s5 }
 0x5ff   : > { %p1890_p11 = scmp.lt.u32.totalorder %s1888_s9, %s1884_s11  ;;  %p1892_p6 = scmp.lt.u32.totalorder %s1884_s11, %s2475_s17 }
 0x600   : > { %p1886_p8 = pnand %p1885_p2, %p2558_p5 }
 0x601   : > { %p1891_p1 = por %p1890_p11, %p1889_p10 }
 0x602   : > { %p1887_p4 = pneg %p1886_p8 }
 0x603   : > { %p1893_p7 = por %p1892_p6, %p1891_p1 }
 0x605   : > { %p1894_p9 = pnand %p1893_p7, %p1887_p4 }
 0x607   : > { %1897 = shalt.err (!%p1894_p9)
}
 0x608   : > { %1627 = dma.vmem_to_hbm [thread:$0]  (%p2558_p5), %s2477_s8, 128, %s2475_s17, %s1395_s22  }
 0x609 PF: > { %s1421_s15 = sand.u32 1, %s1932_s18   ;;  %p2559_p12 = scmp.ne.s32.totalorder %s2535_s12, 0 }
 0x60a   : > { %p2560_p3 = scmp.ge.s32.totalorder %s1944_s21, 2  ;;  %s1422_s16 = scalar_lea.sflag [#allocation4], %s1421_s15 }
 0x60c   : > { %p1647_p13 = pnand %p2560_p3, %p2559_p12 }
 0x60e   : > { %1927 = dma.done.wait (!%p1647_p13), %s1422_s16, 128  }
 0x60f   : > { %1929 = vsyncadd (!%p1647_p13), %s1422_s16, 4294967168  ;;  %p20_p0 = scmp.ge.s32.totalorder %s2135_s28, 4   ;;  %s2561_s18 = smov %s1936_s19 }
 0x610   : > { %s2562_s19 = smov %s1940_s20  ;;  %s2563_s20 = smov %s2146_s27 }
 0x611   : > { %s2564_s21 = smov %s2135_s28  ;;  %22 = sbr.rel (!%p20_p0) target bundleno = 7 (0x7), region = 117 }
 0x618   :  { %1427 = vsyncpa [#allocation3], 1 }
 0x619   :  { %1429 = vsyncpa [#allocation3 + $0x1], 1 }
 0x61a   :  { %1430 = vsyncpa [#allocation6], 1 }
 0x61b   :  { %1431 = vsyncpa [#allocation9], 1 }
 0x61c   :  { %1432 = vsyncpa [#allocation4], 1 }
 0x61d   :  { %1434 = vsyncpa [#allocation4 + $0x1], 1 }

</bundles_post_ra>
